<compile_context>
chip_gen: v7x
topology: tpu7x:2x2x1
jax: 0.10.0
libtpu: 0.0.40
codegen_flags: <defaults>
</compile_context>

<pallas_src>
import jax
import jax.numpy as jnp
from jax.experimental import pallas as pl
from jax.experimental.pallas import tpu as pltpu

IN_F = 20
OUT_F = 20
K_CAT = 3 * IN_F          # 60  (concatenated feature dim)
OUT_USED = 2 * OUT_F      # 40  (useful output columns)
OUT_PAD = 128             # lane-dense output slab width


def _round_up(n, m):
    return ((n + m - 1) // m) * m


def _fused_kernel(x_ref, w_ref, b_ref, out_ref):
    # Single MXU matmul over the pre-built block weight, bias add, one
    # unmasked lane-dense store.
    out_ref[...] = (
        jnp.dot(x_ref[...], w_ref[...], preferred_element_type=jnp.float32)
        + b_ref[...]
    ).astype(out_ref.dtype)


def fused_triple_linear(x0, x1, x2, params):
    (w0, b0), (w1, b1), (w2, b2) = params
    B = x0.shape[0]

    # ---- one-time wrapper-side prep (constant-folded / fused by XLA) ----
    # Pre-transposed block weight: y = X_cat @ W_cat + b_cat
    #   columns  0:20 -> v0 + v1,   columns 20:40 -> v0 + v2
    wt0, wt1, wt2 = w0.T, w1.T, w2.T                      # (IN_F, OUT_F)
    zeros = jnp.zeros((IN_F, OUT_F), jnp.float32)
    w_cat = jnp.concatenate(
        [
            jnp.concatenate([wt0, wt0], axis=1),
            jnp.concatenate([wt1, zeros], axis=1),
            jnp.concatenate([zeros, wt2], axis=1),
        ],
        axis=0,
    )                                                      # (60, 40)
    b_cat = jnp.concatenate([b0 + b1, b0 + b2])            # (40,)

    # Pad output columns to 128 lanes (unmasked stores).
    w_pad = jnp.zeros((K_CAT, OUT_PAD), jnp.float32).at[:, :OUT_USED].set(w_cat)
    b_pad = jnp.zeros((1, OUT_PAD), jnp.float32).at[:, :OUT_USED].set(b_cat)

    # Concatenate inputs and pad batch to a sublane-friendly tile multiple.
    x_cat = jnp.concatenate([x0, x1, x2], axis=1)          # (B, 60)
    TB = min(512, _round_up(B, 8))                         # batch tile (rows)
    B_pad = _round_up(B, TB)
    if B_pad != B:
        x_cat = jnp.pad(x_cat, ((0, B_pad - B), (0, 0)))

    grid = (B_pad // TB,)

    out = pl.pallas_call(
        _fused_kernel,
        out_shape=jax.ShapeDtypeStruct((B_pad, OUT_PAD), jnp.float32),
        grid=grid,
        in_specs=[
            pl.BlockSpec((TB, K_CAT), lambda i: (i, 0)),        # X tile
            pl.BlockSpec((K_CAT, OUT_PAD), lambda i: (0, 0)),   # block weight
            pl.BlockSpec((1, OUT_PAD), lambda i: (0, 0)),       # fused bias
        ],
        out_specs=pl.BlockSpec((TB, OUT_PAD), lambda i: (i, 0)),
        compiler_params=pltpu.CompilerParams(
            dimension_semantics=("parallel",),   # shard batch across TCs (v7x)
        ),
    )(x_cat, w_pad, b_pad)

    out_a = out[:B, :OUT_F]
    out_b = out[:B, OUT_F:OUT_USED]
    return out_a, out_b


def init_params(key):
    # Deterministic Linear(20, 20) init (PyTorch-style uniform bound).
    bound = 1.0 / (IN_F ** 0.5)
    keys = jax.random.split(key, 6)
    params = []
    for i in range(3):
        w = jax.random.uniform(keys[2 * i], (OUT_F, IN_F),
                               minval=-bound, maxval=bound, dtype=jnp.float32)
        b = jax.random.uniform(keys[2 * i + 1], (OUT_F,),
                               minval=-bound, maxval=bound, dtype=jnp.float32)
        params.append((w, b))
    return params


if __name__ == "__main__":
    key = jax.random.PRNGKey(0)
    k0, k1, k2, kp = jax.random.split(key, 4)

    x0 = jax.random.normal(k0, (10, IN_F), dtype=jnp.float32)
    x1 = jax.random.normal(k1, (10, IN_F), dtype=jnp.float32)
    x2 = jax.random.normal(k2, (10, IN_F), dtype=jnp.float32)

    params = init_params(kp)

    out_a, out_b = fused_triple_linear(x0, x1, x2, params)
    jax.block_until_ready((out_a, out_b))

    # Pure-JAX reference check (note: single fused matmul changes add order,
    # still within tolerance).
    (w0, b0), (w1, b1), (w2, b2) = params
    v0 = x0 @ w0.T + b0
    v1 = x1 @ w1.T + b1
    v2 = x2 @ w2.T + b2
    assert jnp.allclose(out_a, v0 + v1, atol=1e-4, rtol=1e-5)
    assert jnp.allclose(out_b, v0 + v2, atol=1e-4, rtol=1e-5)

    print("KERNEL_OK")
</pallas_src>

<mosaic_0001>
module attributes {stable_mosaic.version = 11 : i64} {
  func.func @_fused_kernel(%arg0: i32, %arg1: memref<16x60xf32, #tpu.memory_space<vmem>>, %arg2: memref<60x128xf32, #tpu.memory_space<vmem>>, %arg3: memref<1x128xf32, #tpu.memory_space<vmem>>, %arg4: memref<16x128xf32, #tpu.memory_space<vmem>>) attributes {dimension_semantics = [#tpu.dimension_semantics<parallel>], iteration_bounds = array<i64: 1>, scalar_prefetch = 0 : i64, scratch_operands = 0 : i64, tpu.core_type = #tpu.core_type<tc>, window_params = [{transform_indices = @transform_0, window_bounds = array<i64: 16, 60>}, {pipeline_mode = #tpu.pipeline_mode<synchronous>, transform_indices = @transform_1, window_bounds = array<i64: 60, 128>}, {pipeline_mode = #tpu.pipeline_mode<synchronous>, transform_indices = @transform_2, window_bounds = array<i64: 1, 128>}, {transform_indices = @transform_3, window_bounds = array<i64: 16, 128>}]} {
    %c0 = arith.constant 0 : index
    %c0_0 = arith.constant 0 : index
    %0 = vector.load %arg1[%c0, %c0_0] : memref<16x60xf32, #tpu.memory_space<vmem>>, vector<16x60xf32>
    %c0_1 = arith.constant 0 : index
    %c0_2 = arith.constant 0 : index
    %1 = vector.load %arg2[%c0_1, %c0_2] : memref<60x128xf32, #tpu.memory_space<vmem>>, vector<60x128xf32>
    %cst = arith.constant dense<0.000000e+00> : vector<16x128xf32>
    %2 = tpu.matmul %0, %1, %cst {dimension_numbers = #tpu.dot_dimension_numbers<[1], [0], [0], [1], [0, 0, 1, 1], [], []>} : vector<16x60xf32>, vector<60x128xf32>, vector<16x128xf32> -> vector<16x128xf32>
    %c0_3 = arith.constant 0 : index
    %c0_4 = arith.constant 0 : index
    %3 = vector.load %arg3[%c0_3, %c0_4] : memref<1x128xf32, #tpu.memory_space<vmem>>, vector<1x128xf32>
    %4 = vector.broadcast %3 : vector<1x128xf32> to vector<16x128xf32>
    %5 = arith.addf %2, %4 : vector<16x128xf32>
    %c0_5 = arith.constant 0 : index
    %c0_6 = arith.constant 0 : index
    %6 = vector.load %arg4[%c0_5, %c0_6] : memref<16x128xf32, #tpu.memory_space<vmem>>, vector<16x128xf32>
    tpu.vector_store %arg4[%c0_5, %c0_6], %5 {strides = array<i32>} : memref<16x128xf32, #tpu.memory_space<vmem>>, vector<16x128xf32>,
    return
  }
  func.func @transform_0(%arg0: i32) -> (i32, i32) {
    %c0_i32 = arith.constant 0 : i32
    %c0_i32_0 = arith.constant 0 : i32
    return %arg0, %c0_i32 : i32, i32
  }
  func.func @transform_1(%arg0: i32) -> (i32, i32) {
    %c0_i32 = arith.constant 0 : i32
    %c0_i32_0 = arith.constant 0 : i32
    %c0_i32_1 = arith.constant 0 : i32
    return %c0_i32, %c0_i32_0 : i32, i32
  }
  func.func @transform_2(%arg0: i32) -> (i32, i32) {
    %c0_i32 = arith.constant 0 : i32
    %c0_i32_0 = arith.constant 0 : i32
    %c0_i32_1 = arith.constant 0 : i32
    return %c0_i32, %c0_i32_0 : i32, i32
  }
  func.func @transform_3(%arg0: i32) -> (i32, i32) {
    %c0_i32 = arith.constant 0 : i32
    %c0_i32_0 = arith.constant 0 : i32
    return %arg0, %c0_i32 : i32, i32
  }
}

</mosaic_0001>

<bundles_post_ra>
// kernel: tpu_custom_call.1
= control target key start
LH: loop header
LB: loop body
LE: loop exit
PB: predicated region body
PF: predicated region fallthrough
CT: control target
= control target key end

     0   :  { %8 = vsyncpa [#allocation3], 0  ;;  %s371_s0 = inlined_call_operand.hbm [shape: f32[16,60], index: 0, kind: input, shape index: {}]   ;;  %s372_s1 = inlined_call_operand.hbm [shape: f32[60,128], index: 1, kind: input, shape index: {}]   ;;  %s373_s2 = inlined_call_operand.vmem [shape: f32[1,128], index: 2, kind: input, shape index: {}]   ;;  %s374_s3 = inlined_call_operand.hbm [shape: f32[16,128], index: 3, kind: output, shape index: {}]  }
   0x1   :  { %9 = vsyncpa [#allocation6], 0 }
   0x2   :  { %10 = vsyncpa [#allocation4], 0  ;;  %s295_s12 = smov [#allocation2]   ;;  %s223_s16 = scalar_lea.hbm %s371_s0, 256 }
   0x3   :  { %s16_s13 = sshll.u32 %s295_s12, 4  ;;  %p224_p0 = scmp.ne.s32.totalorder %s371_s0, %s223_s16  ;;  %s17_s13 = int_to_ptr.vmem [resolvable:$true] %s16_s13 }
   0x4   :  { %p227_p1 = scmp.lt.u32.totalorder %s223_s16, %s371_s0 }
   0x6   :  { %p229_p2 = pnand %p227_p1, %p224_p0 }
   0x8   :  { %232 = shalt.err (!%p229_p2)
}
   0x9   :  { %s233_s21 = scalar_lea.vmem %s17_s13, 256  ;;  %p238_p4 = scmp.lt.s32.totalorder %s17_s13, %s17_s13 }
   0xa   :  { %p234_p3 = scmp.ne.s32.totalorder %s17_s13, %s233_s21  ;;  %p239_p5 = scmp.lt.s32.totalorder %s233_s21, %s233_s21 }
   0xc   :  { %p240_p6 = por %p239_p5, %p238_p4 }
   0xe   :  { %p241_p7 = pnand %p240_p6, %p234_p3 }
  0x10   :  { %244 = shalt.err (!%p241_p7)
}
  0x11   :  { %s296_s22 = smov 128   ;;  %s297_s23 = smov 8  }
  0x12   :  { %22 = dma.hbm_to_vmem [thread:$0]  %s371_s0, 256, %s17_s13, [#allocation3], %s296_s22, %s296_s22, %s297_s23  }
  0x13   :  { %s298_s26 = smov [#allocation5]   ;;  %s245_s30 = scalar_lea.hbm %s372_s1, 1024 }
  0x14   :  { %s28_s27 = sshll.u32 %s298_s26, 4  ;;  %p246_p8 = scmp.ne.s32.totalorder %s372_s1, %s245_s30  ;;  %s29_s27 = int_to_ptr.vmem [resolvable:$true] %s28_s27 }
  0x15   :  { %p249_p9 = scmp.lt.u32.totalorder %s245_s30, %s372_s1 }
  0x17   :  { %p251_p10 = pnand %p249_p9, %p246_p8 }
  0x19   :  { %254 = shalt.err (!%p251_p10)
}
  0x1a   :  { %s255_s8 = scalar_lea.vmem %s29_s27, 1024  ;;  %p260_p12 = scmp.lt.s32.totalorder %s29_s27, %s29_s27 }
  0x1b   :  { %p256_p11 = scmp.ne.s32.totalorder %s29_s27, %s255_s8  ;;  %p261_p13 = scmp.lt.s32.totalorder %s255_s8, %s255_s8 }
  0x1d   :  { %p262_p0 = por %p261_p13, %p260_p12 }
  0x1f   :  { %p263_p1 = pnand %p262_p0, %p256_p11 }
  0x21   :  { %266 = shalt.err (!%p263_p1)
}
  0x22   :  { %34 = dma.hbm_to_vmem [thread:$0]  %s372_s1, 1024, %s29_s27, [#allocation6], %s296_s22, %s296_s22, %s297_s23  }
  0x23   :  { %289 = dma.done.wait [#allocation3], 256  }
  0x24   :  { %290 = vsyncadd [#allocation3], 4294967040 }
  0x25   :  { %291 = dma.done.wait [#allocation6], 1024  }
  0x26   :  { %292 = vsyncadd [#allocation6], 4294966272  ;;  %v45_v0 = vld [vmem:[#allocation5] sm:$0xff]  ;;  %v46_v1 = vld [vmem:[#allocation5 + $0x8] sm:$0xff]  ;;  %vm60_vm0 = vcmask 490496   ;;  %vm67_vm1 = vcmask 1043456  }
  0x27   :  { %v47_v2 = vld [vmem:[#allocation5 + $0x10] sm:$0xff]  ;;  %v199_v3 = vpack.c.bf16 %v46_v1, %v45_v0  ;;  %v48_v4 = vld [vmem:[#allocation5 + $0x18] sm:$0xff]  ;;  %v49_v6 = vld [vmem:[#allocation5 + $0x20] sm:$0xff]  ;;  %vm299_vm2 = vmmov 1   ;;  %s300_s11 = smov [#allocation7]  }
  0x28   :  { %v203_v5 = vpack.c.bf16 %v48_v4, %v47_v2  ;;  %v50_v7 = vld [vmem:[#allocation5 + $0x28] sm:$0xff]  ;;  %v43_v8 = vld [vmem:[#allocation2] sm:$0xff]  ;;  %v52_v11 = vld [vmem:[#allocation5 + $0x38] sm:$0xf]  ;;  %s153_s12 = sshll.u32 %s300_s11, 4  ;;  %s154_s12 = int_to_ptr.vmem [resolvable:$true] %s153_s12 }
  0x29   :  { %200 = vmatprep.subr.bf16.mxu0 %v199_v3  ;;  %196 = vmatprep.mubr.msk.f32.mxu0 %vm60_vm0, %v43_v8  ;;  %v207_v9 = vpack.c.bf16 %v50_v7, %v49_v6  ;;  %v51_v10 = vld [vmem:[#allocation5 + $0x30] sm:$0xff]  ;;  %vm212_vm3 = vmpackc.low %vm67_vm1, %vm299_vm2  ;;  %v44_v13 = vld [vmem:[#allocation2 + $0x8] sm:$0xff]  ;;  %s267_s13 = scalar_lea.vmem %s154_s12, 256  ;;  %p272_p3 = scmp.lt.s32.totalorder %s154_s12, %s154_s12 }
  0x2a   :  { %202 = vmatpush3.bf16.msra.mxu0 %v199_v3  ;;  %v211_v12 = vpack.c.bf16 %v52_v11, %v51_v10  ;;  %v166_v14 = vld [vmem:[%s373_s2] ss:$0 sm:$0xff]  ;;  %p268_p2 = scmp.ne.s32.totalorder %s154_s12, %s267_s13  ;;  %p273_p4 = scmp.lt.s32.totalorder %s267_s13, %s267_s13 }
  0x2b   :  { %204 = vmatprep.subr.bf16.mxu0 %v203_v5 }
  0x2c   :  { %p274_p5 = por %p273_p4, %p272_p3 }
  0x2e   :  { %206 = vmatpush3.bf16.msra.mxu0 %v203_v5  ;;  %p275_p6 = pnand %p274_p5, %p268_p2 }
  0x2f   :  { %208 = vmatprep.subr.bf16.mxu0 %v207_v9 }
  0x32   :  { %210 = vmatpush3.bf16.msra.mxu0 %v207_v9 }
  0x33   :  { %213 = vmatprep.subr.msk.bf16.mxu0 %vm212_vm3, %v211_v12 }
  0x36   :  { %216 = vmatpush3.bf16.msk.msra.mxu0 %vm212_vm3, %v211_v12 }
  0x39   :  { %197 = vmatmul.mubr.msk.f32.vlgmr.msra.gmra.mrb[0].mxu0 %vm60_vm0, %v44_v13 }
 0x10c   :  { %v198_v15 = vpop.f32.mrb[0].mxu0 }
 0x10d   :  { %v143_v16 = vadd.f32 %v198_v15, %v166_v14  ;;  %v137_v17 = vpop.f32.mrb[1].mxu0 }
 0x10e   :  { %v138_v18 = vadd.f32 %v166_v14, %v137_v17 }
 0x10f   :  { %147 = vst [vmem:[#allocation7 + $0x8] sm:$0xff] %v143_v16 }
 0x110   :  { %146 = vst [vmem:[#allocation7] sm:$0xff] %v138_v18 }
 0x111   :  { %278 = shalt.err (!%p275_p6)
}
 0x112   :  { %s279_s2 = scalar_lea.hbm %s374_s3, 256 }
 0x113   :  { %p280_p7 = scmp.ne.s32.totalorder %s374_s3, %s279_s2  ;;  %p283_p8 = scmp.lt.u32.totalorder %s279_s2, %s374_s3 }
 0x115   :  { %p285_p9 = pnand %p283_p8, %p280_p7 }
 0x117   :  { %288 = shalt.err (!%p285_p9)
}
 0x118   :  { %159 = dma.vmem_to_hbm [thread:$0]  %s154_s12, 256, %s374_s3, [#allocation4], %s296_s22, %s296_s22, %s297_s23  }
 0x119   :  { %293 = dma.done.wait [#allocation4], 256  }
 0x11a   :  { %294 = vsyncadd [#allocation4], 4294967040 }
 0x11b   :  { %163 = vsyncpa [#allocation3], 1 }
 0x11c   :  { %164 = vsyncpa [#allocation6], 1 }
 0x11d   :  { %165 = vsyncpa [#allocation4], 1 }

</bundles_post_ra>
